<compile_context>
chip_gen: v7x
topology: tpu7x:2x2x1
jax: 0.10.0
libtpu: 0.0.40
codegen_flags: <defaults>
</compile_context>

<pallas_src>
import math

import jax
import jax.numpy as jnp
from jax.experimental import pallas as pl
from jax.experimental.pallas import tpu as pltpu


def _round_up(n, m):
    return (n + m - 1) // m * m


def _patch_embed_kernel(x_ref, w_ref, b_ref, o_ref):
    # (tm, Kp) @ (Kp, Ep) + (1, Ep) -> (tm, Ep): the strided patch conv as a GEMM.
    acc = jnp.dot(x_ref[...], w_ref[...], preferred_element_type=jnp.float32)
    acc = acc + b_ref[...]
    o_ref[...] = acc.astype(o_ref.dtype)


def patch_embed_pallas(x, proj_w, proj_b, patch_size=(4, 4), *, tm=256):
    """Swin PatchEmbed forward.

    x:      (B, C, H, W)
    proj_w: (E, C, ph, pw)  -- torch Conv2d weight layout
    proj_b: (E,)
    returns (B, num_patches, E) == conv(x).flatten(2).transpose(1, 2)
    """
    B, C, H, W = x.shape
    ph, pw = patch_size
    assert H % ph == 0 and W % pw == 0, "image size must be divisible by patch size"
    Hp, Wp = H // ph, W // pw
    E = proj_w.shape[0]
    K = C * ph * pw

    # Non-overlapping stride==kernel conv == GEMM over flattened patches.
    # Patch-vector order must be (c, u, v) to match Conv2d weight flattening.
    xp = x.reshape(B, C, Hp, ph, Wp, pw)
    xp = xp.transpose(0, 2, 4, 1, 3, 5)              # (B, Hp, Wp, C, ph, pw)
    xp = xp.reshape(B * Hp * Wp, K)                  # rows ordered (b, i, j)
    wk = proj_w.reshape(E, K).T                      # (K, E)

    M = B * Hp * Wp
    # Lane-dense (x128) feature dims; row tile a multiple of 8, up to `tm`.
    Kp = _round_up(K, 128)
    Ep = _round_up(E, 128)
    tm_eff = min(tm, _round_up(M, 8))
    Mp = _round_up(M, tm_eff)

    xp = jnp.pad(xp, ((0, Mp - M), (0, Kp - K)))     # zero-pad: no effect on dot
    wk = jnp.pad(wk, ((0, Kp - K), (0, Ep - E)))
    bk = jnp.pad(proj_b, (0, Ep - E)).reshape(1, Ep)

    itemsize = max(jnp.dtype(x.dtype).itemsize, 4)
    vmem_bytes = 2 * (tm_eff * Kp + Kp * Ep + Ep + tm_eff * Ep) * itemsize
    vmem_bytes = min(max(vmem_bytes + (2 << 20), 4 << 20), 64 << 20)

    out = pl.pallas_call(
        _patch_embed_kernel,
        out_shape=jax.ShapeDtypeStruct((Mp, Ep), x.dtype),
        grid_spec=pltpu.PrefetchScalarGridSpec(
            num_scalar_prefetch=0,
            grid=(Mp // tm_eff,),
            in_specs=[
                pl.BlockSpec((tm_eff, Kp), lambda i: (i, 0)),   # patch rows
                pl.BlockSpec((Kp, Ep), lambda i: (0, 0)),       # proj weight (resident)
                pl.BlockSpec((1, Ep), lambda i: (0, 0)),        # bias
            ],
            out_specs=pl.BlockSpec((tm_eff, Ep), lambda i: (i, 0)),
        ),
        compiler_params=pltpu.CompilerParams(
            dimension_semantics=("parallel",),          # shards rows across TCs on v7x
            vmem_limit_bytes=vmem_bytes),
    )(xp, wk, bk)

    out = out[:M, :E].reshape(B, Hp * Wp, E)
    # TODO(synk): optional norm_layer (LayerNorm over embed_dim) is not fused here;
    # the PatchEmbed default norm_layer=None (identity) is what this implements.
    return out


def patch_embed_reference(x, proj_w, proj_b, patch_size=(4, 4)):
    y = jax.lax.conv_general_dilated(
        x, proj_w, window_strides=patch_size, padding="VALID",
        dimension_numbers=("NCHW", "OIHW", "NCHW"),
        precision=jax.lax.Precision.HIGHEST)
    y = y + proj_b.reshape(1, -1, 1, 1)
    B, E, Hp, Wp = y.shape
    return y.reshape(B, E, Hp * Wp).transpose(0, 2, 1)


if __name__ == "__main__":
    key = jax.random.PRNGKey(0)
    kx, kw, kb = jax.random.split(key, 3)

    # Small shapes consistent with the module: (B, in_chans, H, W), patch=4.
    B, C_IN, IMG, PATCH, EMBED = 2, 3, 16, 4, 96
    x = jax.random.normal(kx, (B, C_IN, IMG, IMG), dtype=jnp.float32)

    fan_in = C_IN * PATCH * PATCH
    bound = 1.0 / math.sqrt(fan_in)
    proj_w = jax.random.uniform(kw, (EMBED, C_IN, PATCH, PATCH),
                                jnp.float32, -bound, bound)
    proj_b = jax.random.uniform(kb, (EMBED,), jnp.float32, -bound, bound)

    y = patch_embed_pallas(x, proj_w, proj_b, (PATCH, PATCH))
    y = jax.block_until_ready(y)

    n_patches = (IMG // PATCH) ** 2
    y_ref = patch_embed_reference(x, proj_w, proj_b, (PATCH, PATCH))
    assert y.shape == (B, n_patches, EMBED), y.shape
    assert jnp.allclose(y, y_ref, atol=1e-3, rtol=1e-3), \
        float(jnp.max(jnp.abs(y - y_ref)))

    print("KERNEL_OK")
</pallas_src>

<mosaic_0001>
module attributes {stable_mosaic.version = 11 : i64} {
  func.func @_patch_embed_kernel(%arg0: i32, %arg1: memref<32x128xf32, #tpu.memory_space<vmem>>, %arg2: memref<128x128xf32, #tpu.memory_space<vmem>>, %arg3: memref<1x128xf32, #tpu.memory_space<vmem>>, %arg4: memref<32x128xf32, #tpu.memory_space<vmem>>) attributes {dimension_semantics = [#tpu.dimension_semantics<parallel>], iteration_bounds = array<i64: 1>, scalar_prefetch = 0 : i64, scratch_operands = 0 : i64, tpu.core_type = #tpu.core_type<tc>, window_params = [{transform_indices = @transform_0, window_bounds = array<i64: 32, 128>}, {pipeline_mode = #tpu.pipeline_mode<synchronous>, transform_indices = @transform_1, window_bounds = array<i64: 128, 128>}, {pipeline_mode = #tpu.pipeline_mode<synchronous>, transform_indices = @transform_2, window_bounds = array<i64: 1, 128>}, {transform_indices = @transform_3, window_bounds = array<i64: 32, 128>}]} {
    %c0 = arith.constant 0 : index
    %c0_0 = arith.constant 0 : index
    %0 = vector.load %arg1[%c0, %c0_0] : memref<32x128xf32, #tpu.memory_space<vmem>>, vector<32x128xf32>
    %c0_1 = arith.constant 0 : index
    %c0_2 = arith.constant 0 : index
    %1 = vector.load %arg2[%c0_1, %c0_2] : memref<128x128xf32, #tpu.memory_space<vmem>>, vector<128x128xf32>
    %cst = arith.constant dense<0.000000e+00> : vector<32x128xf32>
    %2 = tpu.matmul %0, %1, %cst {dimension_numbers = #tpu.dot_dimension_numbers<[1], [0], [0], [1], [0, 0, 1, 1], [], []>} : vector<32x128xf32>, vector<128x128xf32>, vector<32x128xf32> -> vector<32x128xf32>
    %c0_3 = arith.constant 0 : index
    %c0_4 = arith.constant 0 : index
    %3 = vector.load %arg3[%c0_3, %c0_4] : memref<1x128xf32, #tpu.memory_space<vmem>>, vector<1x128xf32>
    %4 = vector.broadcast %3 : vector<1x128xf32> to vector<32x128xf32>
    %5 = arith.addf %2, %4 : vector<32x128xf32>
    %c0_5 = arith.constant 0 : index
    %c0_6 = arith.constant 0 : index
    %6 = vector.load %arg4[%c0_5, %c0_6] : memref<32x128xf32, #tpu.memory_space<vmem>>, vector<32x128xf32>
    tpu.vector_store %arg4[%c0_5, %c0_6], %5 {strides = array<i32>} : memref<32x128xf32, #tpu.memory_space<vmem>>, vector<32x128xf32>,
    return
  }
  func.func @transform_0(%arg0: i32) -> (i32, i32) {
    %c0_i32 = arith.constant 0 : i32
    %c0_i32_0 = arith.constant 0 : i32
    return %arg0, %c0_i32 : i32, i32
  }
  func.func @transform_1(%arg0: i32) -> (i32, i32) {
    %c0_i32 = arith.constant 0 : i32
    %c0_i32_0 = arith.constant 0 : i32
    %c0_i32_1 = arith.constant 0 : i32
    return %c0_i32, %c0_i32_0 : i32, i32
  }
  func.func @transform_2(%arg0: i32) -> (i32, i32) {
    %c0_i32 = arith.constant 0 : i32
    %c0_i32_0 = arith.constant 0 : i32
    %c0_i32_1 = arith.constant 0 : i32
    return %c0_i32, %c0_i32_0 : i32, i32
  }
  func.func @transform_3(%arg0: i32) -> (i32, i32) {
    %c0_i32 = arith.constant 0 : i32
    %c0_i32_0 = arith.constant 0 : i32
    return %arg0, %c0_i32 : i32, i32
  }
}

</mosaic_0001>

<bundles_post_ra>
// kernel: tpu_custom_call.1
= control target key start
LH: loop header
LB: loop body
LE: loop exit
PB: predicated region body
PF: predicated region fallthrough
CT: control target
= control target key end

     0   :  { %8 = vsyncpa [#allocation3], 0  ;;  %s434_s0 = inlined_call_operand.hbm [shape: f32[32,128], index: 0, kind: input, shape index: {}]   ;;  %s435_s1 = inlined_call_operand.hbm [shape: f32[128,128], index: 1, kind: input, shape index: {}]   ;;  %s436_s2 = inlined_call_operand.vmem [shape: f32[1,128], index: 2, kind: input, shape index: {}]   ;;  %s437_s3 = inlined_call_operand.hbm [shape: f32[32,128], index: 3, kind: output, shape index: {}]  }
   0x1   :  { %9 = vsyncpa [#allocation6], 0 }
   0x2   :  { %10 = vsyncpa [#allocation4], 0  ;;  %s361_s12 = smov [#allocation2]   ;;  %s289_s16 = scalar_lea.hbm %s434_s0, 512 }
   0x3   :  { %s16_s13 = sshll.u32 %s361_s12, 4  ;;  %p290_p0 = scmp.ne.s32.totalorder %s434_s0, %s289_s16  ;;  %s17_s13 = int_to_ptr.vmem [resolvable:$true] %s16_s13 }
   0x4   :  { %p293_p1 = scmp.lt.u32.totalorder %s289_s16, %s434_s0 }
   0x6   :  { %p295_p2 = pnand %p293_p1, %p290_p0 }
   0x8   :  { %298 = shalt.err (!%p295_p2)
}
   0x9   :  { %s299_s21 = scalar_lea.vmem %s17_s13, 512  ;;  %p304_p4 = scmp.lt.s32.totalorder %s17_s13, %s17_s13 }
   0xa   :  { %p300_p3 = scmp.ne.s32.totalorder %s17_s13, %s299_s21  ;;  %p305_p5 = scmp.lt.s32.totalorder %s299_s21, %s299_s21 }
   0xc   :  { %p306_p6 = por %p305_p5, %p304_p4 }
   0xe   :  { %p307_p7 = pnand %p306_p6, %p300_p3 }
  0x10   :  { %310 = shalt.err (!%p307_p7)
}
  0x11   :  { %s362_s22 = smov 128   ;;  %s363_s23 = smov 8  }
  0x12   :  { %22 = dma.hbm_to_vmem [thread:$0]  %s434_s0, 512, %s17_s13, [#allocation3], %s362_s22, %s362_s22, %s363_s23  }
  0x13   :  { %s364_s26 = smov [#allocation5]   ;;  %s311_s30 = scalar_lea.hbm %s435_s1, 2048 }
  0x14   :  { %s28_s27 = sshll.u32 %s364_s26, 4  ;;  %p312_p8 = scmp.ne.s32.totalorder %s435_s1, %s311_s30  ;;  %s29_s27 = int_to_ptr.vmem [resolvable:$true] %s28_s27 }
  0x15   :  { %p315_p9 = scmp.lt.u32.totalorder %s311_s30, %s435_s1 }
  0x17   :  { %p317_p10 = pnand %p315_p9, %p312_p8 }
  0x19   :  { %320 = shalt.err (!%p317_p10)
}
  0x1a   :  { %s321_s8 = scalar_lea.vmem %s29_s27, 2048  ;;  %p326_p12 = scmp.lt.s32.totalorder %s29_s27, %s29_s27 }
  0x1b   :  { %p322_p11 = scmp.ne.s32.totalorder %s29_s27, %s321_s8  ;;  %p327_p13 = scmp.lt.s32.totalorder %s321_s8, %s321_s8 }
  0x1d   :  { %p328_p0 = por %p327_p13, %p326_p12 }
  0x1f   :  { %p329_p1 = pnand %p328_p0, %p322_p11 }
  0x21   :  { %332 = shalt.err (!%p329_p1)
}
  0x22   :  { %34 = dma.hbm_to_vmem [thread:$0]  %s435_s1, 2048, %s29_s27, [#allocation6], %s362_s22, %s362_s22, %s363_s23  }
  0x23   :  { %355 = dma.done.wait [#allocation3], 512  }
  0x24   :  { %356 = vsyncadd [#allocation3], 4294966784 }
  0x25   :  { %357 = dma.done.wait [#allocation6], 2048  }
  0x26   :  { %358 = vsyncadd [#allocation6], 4294965248  ;;  %v47_v0 = vld [vmem:[#allocation5] sm:$0xff]  ;;  %v48_v1 = vld [vmem:[#allocation5 + $0x8] sm:$0xff]  ;;  %s365_s11 = smov [#allocation7]  }
  0x27   :  { %v49_v2 = vld [vmem:[#allocation5 + $0x10] sm:$0xff]  ;;  %v236_v3 = vpack.c.bf16 %v48_v1, %v47_v0  ;;  %v50_v4 = vld [vmem:[#allocation5 + $0x18] sm:$0xff]  ;;  %v51_v6 = vld [vmem:[#allocation5 + $0x20] sm:$0xff]  ;;  %s164_s12 = sshll.u32 %s365_s11, 4  ;;  %s165_s12 = int_to_ptr.vmem [resolvable:$true] %s164_s12 }
  0x28   :  { %v240_v5 = vpack.c.bf16 %v50_v4, %v49_v2  ;;  %v52_v7 = vld [vmem:[#allocation5 + $0x28] sm:$0xff]  ;;  %v43_v9 = vld [vmem:[#allocation2] sm:$0xff]  ;;  %v45_v10 = vld [vmem:[#allocation2 + $0x10] sm:$0xff]  ;;  %s333_s13 = scalar_lea.vmem %s165_s12, 512  ;;  %p338_p3 = scmp.lt.s32.totalorder %s165_s12, %s165_s12 }
  0x29   :  { %237 = vmatprep.subr.bf16.mxu0 %v236_v3  ;;  %268 = vmatprep.subr.bf16.mxu1 %v236_v3  ;;  %v244_v8 = vpack.c.bf16 %v52_v7, %v51_v6  ;;  %v53_v11 = vld [vmem:[#allocation5 + $0x30] sm:$0xff]  ;;  %v54_v12 = vld [vmem:[#allocation5 + $0x38] sm:$0xff]  ;;  %v55_v14 = vld [vmem:[#allocation5 + $0x40] sm:$0xff]  ;;  %p334_p2 = scmp.ne.s32.totalorder %s165_s12, %s333_s13  ;;  %p339_p4 = scmp.lt.s32.totalorder %s333_s13, %s333_s13 }
  0x2a   :  { %239 = vmatpush3.bf16.msra.mxu0 %v236_v3  ;;  %276 = vmatpush3.bf16.msra.mxu1 %v236_v3  ;;  %v248_v13 = vpack.c.bf16 %v54_v12, %v53_v11  ;;  %v56_v15 = vld [vmem:[#allocation5 + $0x48] sm:$0xff]  ;;  %v57_v17 = vld [vmem:[#allocation5 + $0x50] sm:$0xff]  ;;  %v58_v18 = vld [vmem:[#allocation5 + $0x58] sm:$0xff] }
  0x2b   :  { %241 = vmatprep.subr.bf16.mxu0 %v240_v5  ;;  %269 = vmatprep.subr.bf16.mxu1 %v240_v5  ;;  %v252_v16 = vpack.c.bf16 %v56_v15, %v55_v14  ;;  %v256_v19 = vpack.c.bf16 %v58_v18, %v57_v17  ;;  %v59_v20 = vld [vmem:[#allocation5 + $0x60] sm:$0xff]  ;;  %v60_v21 = vld [vmem:[#allocation5 + $0x68] sm:$0xff]  ;;  %v61_v23 = vld [vmem:[#allocation5 + $0x70] sm:$0xff]  ;;  %p340_p5 = por %p339_p4, %p338_p3 }
  0x2c   :  { %230 = vmatprep.mubr.f32.mxu0 %v43_v9  ;;  %233 = vmatprep.mubr.f32.mxu1 %v45_v10  ;;  %v260_v22 = vpack.c.bf16 %v60_v21, %v59_v20  ;;  %v62_v24 = vld [vmem:[#allocation5 + $0x78] sm:$0xff]  ;;  %v44_v26 = vld [vmem:[#allocation2 + $0x8] sm:$0xff]  ;;  %v177_v28 = vld [vmem:[%s436_s2] ss:$0 sm:$0xff] }
  0x2d   :  { %v264_v25 = vpack.c.bf16 %v62_v24, %v61_v23  ;;  %v46_v27 = vld [vmem:[#allocation2 + $0x18] sm:$0xff]  ;;  %p341_p6 = pnand %p340_p5, %p334_p2 }
  0x2e   :  { %243 = vmatpush3.bf16.msra.mxu0 %v240_v5  ;;  %277 = vmatpush3.bf16.msra.mxu1 %v240_v5 }
  0x2f   :  { %245 = vmatprep.subr.bf16.mxu0 %v244_v8  ;;  %270 = vmatprep.subr.bf16.mxu1 %v244_v8 }
  0x32   :  { %247 = vmatpush3.bf16.msra.mxu0 %v244_v8  ;;  %278 = vmatpush3.bf16.msra.mxu1 %v244_v8 }
  0x33   :  { %249 = vmatprep.subr.bf16.mxu0 %v248_v13  ;;  %271 = vmatprep.subr.bf16.mxu1 %v248_v13 }
  0x36   :  { %251 = vmatpush3.bf16.msra.mxu0 %v248_v13  ;;  %279 = vmatpush3.bf16.msra.mxu1 %v248_v13 }
  0x37   :  { %253 = vmatprep.subr.bf16.mxu0 %v252_v16  ;;  %272 = vmatprep.subr.bf16.mxu1 %v252_v16 }
  0x3a   :  { %255 = vmatpush3.bf16.msra.mxu0 %v252_v16  ;;  %280 = vmatpush3.bf16.msra.mxu1 %v252_v16 }
  0x3b   :  { %257 = vmatprep.subr.bf16.mxu0 %v256_v19  ;;  %273 = vmatprep.subr.bf16.mxu1 %v256_v19 }
  0x3e   :  { %259 = vmatpush3.bf16.msra.mxu0 %v256_v19  ;;  %281 = vmatpush3.bf16.msra.mxu1 %v256_v19 }
  0x3f   :  { %261 = vmatprep.subr.bf16.mxu0 %v260_v22  ;;  %274 = vmatprep.subr.bf16.mxu1 %v260_v22 }
  0x42   :  { %263 = vmatpush3.bf16.msra.mxu0 %v260_v22  ;;  %282 = vmatpush3.bf16.msra.mxu1 %v260_v22 }
  0x43   :  { %265 = vmatprep.subr.bf16.mxu0 %v264_v25  ;;  %275 = vmatprep.subr.bf16.mxu1 %v264_v25 }
  0x46   :  { %267 = vmatpush3.bf16.msra.mxu0 %v264_v25  ;;  %283 = vmatpush3.bf16.msra.mxu1 %v264_v25 }
  0x49   :  { %231 = vmatmul.mubr.f32.vlgmr.msra.gmra.mrb[0].mxu0 %v44_v26  ;;  %234 = vmatmul.mubr.f32.vlgmr.msra.gmra.mrb[0].mxu1 %v46_v27 }
 0x11c   :  { %v232_v29 = vpop.f32.mrb[0].mxu0  ;;  %v235_v30 = vpop.f32.mrb[0].mxu1 }
 0x11d   :  { %v142_v31 = vadd.f32 %v232_v29, %v177_v28  ;;  %v152_v32 = vadd.f32 %v235_v30, %v177_v28  ;;  %v136_v33 = vpop.f32.mrb[1].mxu0  ;;  %v146_v34 = vpop.f32.mrb[1].mxu1 }
 0x11e   :  { %v137_v35 = vadd.f32 %v177_v28, %v136_v33  ;;  %v147_v36 = vadd.f32 %v177_v28, %v146_v34 }
 0x11f   :  { %156 = vst [vmem:[#allocation7 + $0x8] sm:$0xff] %v142_v31  ;;  %158 = vst [vmem:[#allocation7 + $0x18] sm:$0xff] %v152_v32 }
 0x120   :  { %155 = vst [vmem:[#allocation7] sm:$0xff] %v137_v35  ;;  %157 = vst [vmem:[#allocation7 + $0x10] sm:$0xff] %v147_v36 }
 0x121   :  { %344 = shalt.err (!%p341_p6)
}
 0x122   :  { %s345_s15 = scalar_lea.hbm %s437_s3, 512 }
 0x123   :  { %p346_p7 = scmp.ne.s32.totalorder %s437_s3, %s345_s15  ;;  %p349_p8 = scmp.lt.u32.totalorder %s345_s15, %s437_s3 }
 0x125   :  { %p351_p9 = pnand %p349_p8, %p346_p7 }
 0x127   :  { %354 = shalt.err (!%p351_p9)
}
 0x128   :  { %170 = dma.vmem_to_hbm [thread:$0]  %s165_s12, 512, %s437_s3, [#allocation4], %s362_s22, %s362_s22, %s363_s23  }
 0x129   :  { %359 = dma.done.wait [#allocation4], 512  }
 0x12a   :  { %360 = vsyncadd [#allocation4], 4294966784 }
 0x12b   :  { %174 = vsyncpa [#allocation3], 1 }
 0x12c   :  { %175 = vsyncpa [#allocation6], 1 }
 0x12d   :  { %176 = vsyncpa [#allocation4], 1 }

</bundles_post_ra>
